<compile_context>
chip_gen: v5e
topology: v5e:2x2
jax: 0.10.0
libtpu: 0.0.40
codegen_flags: <defaults>
</compile_context>

<pallas_src>
import functools

import jax
import jax.numpy as jnp
from jax.experimental import pallas as pl
from jax.experimental.pallas import tpu as pltpu


# ----------------------------- helpers ------------------------------------

# VMEM budgets (bytes): conservative so a single choice is safe on v5e/v6e
# (128 MiB physical) and v7x (64 MiB physical, 32 MiB default scoped).
_VMEM_LIMIT = 32 * 1024 * 1024
_XW_RESIDENT_MAX = 4 * 1024 * 1024   # single-copy budget for a resident XW


def _round_up(x, m):
    return ((x + m - 1) // m) * m


def _pad2d(x, rows, cols):
    return jnp.pad(x, ((0, rows - x.shape[0]), (0, cols - x.shape[1])))


def _choose_tiles(n, *, target=1024, max_waste=0.10):
    """Pick node padding + square (tm == tk) tile.

    * pads N to a multiple of 128 lanes first; only inflates further if the
      extra padding stays under `max_waste`
    * keeps >= 2 row tiles when possible (v7x megacore via 'parallel' axis)
    """
    n128 = _round_up(max(n, 1), 128)
    # cap tile so the row ("parallel") axis keeps >= 2 tiles on larger graphs
    cap = n128 if n128 < 256 else max(128, (n128 // 2) // 128 * 128)
    tile = min(target, cap)
    while tile > 128 and (_round_up(n128, tile) - n128) / n128 > max_waste:
        tile -= 128
    n_pad = _round_up(n128, tile)
    return n_pad, tile


# --------------------- Kernel 1: feature transform X @ W -------------------


def _feature_transform_kernel(x_ref, w_ref, o_ref):
    o_ref[...] = jnp.dot(
        x_ref[...], w_ref[...], preferred_element_type=jnp.float32
    ).astype(o_ref.dtype)


def feature_transform(x, w, *, tm):
    """XW = X @ W, tiled over node rows.  x: (N_pad, F_pad) bf16, w: (F_pad, H_pad) bf16."""
    n_pad, f_pad = x.shape
    h_pad = w.shape[1]
    return pl.pallas_call(
        _feature_transform_kernel,
        out_shape=jax.ShapeDtypeStruct((n_pad, h_pad), jnp.bfloat16),
        grid_spec=pltpu.PrefetchScalarGridSpec(
            num_scalar_prefetch=0,
            grid=(n_pad // tm,),
            in_specs=[
                pl.BlockSpec((tm, f_pad), lambda i: (i, 0)),
                pl.BlockSpec((f_pad, h_pad), lambda i: (0, 0)),
            ],
            out_specs=pl.BlockSpec((tm, h_pad), lambda i: (i, 0)),
        ),
        compiler_params=pltpu.CompilerParams(
            dimension_semantics=("parallel",),
            vmem_limit_bytes=_VMEM_LIMIT,
        ),
    )(x, w)


# ------ Kernel 2: layer-1 aggregate + ReLU, fused with layer-2 X @ W2 ------


def _agg_relu_matmul_kernel(a_ref, xw_ref, scale_ref, b_ref, w2_ref,
                            o_ref, acc_ref, *, tk, xw_resident):
    """acc += A_col @ XW1; last k: XW2 = relu(d^{-1/2}*acc + b1) @ W2."""
    k = pl.program_id(1)

    @pl.when(k == 0)
    def _():
        acc_ref[...] = jnp.zeros_like(acc_ref)

    if xw_resident:
        xw = xw_ref[pl.ds(pl.multiple_of(k * tk, tk), tk), :]
    else:
        xw = xw_ref[...]
    acc_ref[...] += jnp.dot(a_ref[...], xw, preferred_element_type=jnp.float32)

    @pl.when(k == pl.num_programs(1) - 1)
    def _():
        # f32 per-row D^{-1/2} scale, bias, ReLU, then the fused layer-2
        # feature transform.  Extra 128x128 MXU work rides under the
        # memory-bound budget; saves a full pallas_call and an N x h_pad
        # HBM round trip of h.
        h = jnp.maximum(scale_ref[...] * acc_ref[...] + b_ref[...], 0.0)
        o_ref[...] = jnp.dot(
            h.astype(w2_ref.dtype), w2_ref[...],
            preferred_element_type=jnp.float32,
        ).astype(o_ref.dtype)


def gcn_layer1_fused(a_col, xw1, scale, b1, w2, *, tm, tk, xw_resident):
    n_pad = a_col.shape[0]
    h_pad = xw1.shape[1]
    c_pad = w2.shape[1]
    if xw_resident:
        xw_spec = pl.BlockSpec((n_pad, h_pad), lambda i, k: (0, 0))
    else:
        xw_spec = pl.BlockSpec((tk, h_pad), lambda i, k: (k, 0))
    kernel = functools.partial(
        _agg_relu_matmul_kernel, tk=tk, xw_resident=xw_resident)
    return pl.pallas_call(
        kernel,
        out_shape=jax.ShapeDtypeStruct((n_pad, c_pad), jnp.bfloat16),
        grid_spec=pltpu.PrefetchScalarGridSpec(
            num_scalar_prefetch=0,
            grid=(n_pad // tm, n_pad // tk),
            in_specs=[
                pl.BlockSpec((tm, tk), lambda i, k: (i, k)),     # A_col tile
                xw_spec,                                          # XW1
                pl.BlockSpec((tm, 1), lambda i, k: (i, 0)),       # d_i^{-1/2}
                pl.BlockSpec((1, h_pad), lambda i, k: (0, 0)),    # b1
                pl.BlockSpec((h_pad, c_pad), lambda i, k: (0, 0)),  # W2 (resident)
            ],
            out_specs=pl.BlockSpec((tm, c_pad), lambda i, k: (i, 0)),
            scratch_shapes=[pltpu.VMEM((tm, h_pad), jnp.float32)],
        ),
        compiler_params=pltpu.CompilerParams(
            dimension_semantics=("parallel", "arbitrary"),
            vmem_limit_bytes=_VMEM_LIMIT,
        ),
    )(a_col, xw1, scale, b1, w2)


# --------- Kernel 3: layer-2 aggregate + bias + masked log_softmax ---------


def _agg_logsoftmax_kernel(a_ref, xw_ref, scale_ref, b_ref, o_ref, *,
                           tk, xw_resident, num_valid_cols):
    """Accumulate directly into the resident f32 output block; last k does
    bias + masked log_softmax over the valid class columns."""
    k = pl.program_id(1)

    @pl.when(k == 0)
    def _():
        o_ref[...] = jnp.zeros_like(o_ref)

    if xw_resident:
        xw = xw_ref[pl.ds(pl.multiple_of(k * tk, tk), tk), :]
    else:
        xw = xw_ref[...]
    o_ref[...] += jnp.dot(a_ref[...], xw, preferred_element_type=jnp.float32)

    @pl.when(k == pl.num_programs(1) - 1)
    def _():
        z = scale_ref[...] * o_ref[...] + b_ref[...]
        col = jax.lax.broadcasted_iota(jnp.int32, z.shape, 1)
        valid = col < num_valid_cols
        logits = jnp.where(valid, z, jnp.finfo(z.dtype).min)
        m = jnp.max(logits, axis=1, keepdims=True)
        s = logits - m
        lse = jnp.log(
            jnp.sum(jnp.where(valid, jnp.exp(s), 0.0), axis=1, keepdims=True))
        o_ref[...] = s - lse


def gcn_layer2_logsoftmax(a_col, xw2, scale, b2, *, tm, tk, xw_resident,
                          num_valid_cols):
    n_pad = a_col.shape[0]
    c_pad = xw2.shape[1]
    if xw_resident:
        xw_spec = pl.BlockSpec((n_pad, c_pad), lambda i, k: (0, 0))
    else:
        xw_spec = pl.BlockSpec((tk, c_pad), lambda i, k: (k, 0))
    kernel = functools.partial(
        _agg_logsoftmax_kernel, tk=tk, xw_resident=xw_resident,
        num_valid_cols=num_valid_cols)
    return pl.pallas_call(
        kernel,
        out_shape=jax.ShapeDtypeStruct((n_pad, c_pad), jnp.float32),
        grid_spec=pltpu.PrefetchScalarGridSpec(
            num_scalar_prefetch=0,
            grid=(n_pad // tm, n_pad // tk),
            in_specs=[
                pl.BlockSpec((tm, tk), lambda i, k: (i, k)),     # A_col tile
                xw_spec,                                          # XW2
                pl.BlockSpec((tm, 1), lambda i, k: (i, 0)),       # d_i^{-1/2}
                pl.BlockSpec((1, c_pad), lambda i, k: (0, 0)),    # b2
            ],
            out_specs=pl.BlockSpec((tm, c_pad), lambda i, k: (i, 0)),
        ),
        compiler_params=pltpu.CompilerParams(
            dimension_semantics=("parallel", "arbitrary"),
            vmem_limit_bytes=_VMEM_LIMIT,
        ),
    )(a_col, xw2, scale, b2)


# ----------------------------- plain-JAX glue ------------------------------


def build_normalized_adjacency_colscaled(edge_index, num_nodes):
    """Dense equivalent of PyG gcn_norm, factored as:
         A_hat = diag(d^{-1/2}) @ A_col,   A_col = (A + I) * d_j^{-1/2}
    A_col is streamed in bf16; the per-row d^{-1/2} stays f32 (applied in the
    kernel epilogue).
    TODO(synk): block-sparse / scalar-prefetch (CSR) aggregation instead of
    densifying an N x N adjacency.
    """
    row, col = edge_index[0], edge_index[1]
    a = jnp.zeros((num_nodes, num_nodes), dtype=jnp.float32)
    a = a.at[row, col].add(1.0)                       # scatter-add edge weights
    a = a + jnp.eye(num_nodes, dtype=jnp.float32)     # self-loops
    deg = jnp.sum(a, axis=1)
    d_inv_sqrt = jnp.where(deg > 0, 1.0 / jnp.sqrt(deg), 0.0)
    a_col = a * d_inv_sqrt[None, :]
    return a_col, d_inv_sqrt


def kipf_gcn_forward(x, edge_index, params):
    n, f_in = x.shape
    gcn_dim = params["w1"].shape[1]
    num_class = params["w2"].shape[1]

    a_col, d_inv_sqrt = build_normalized_adjacency_colscaled(edge_index, n)

    # Padding to lane/tile-friendly shapes; bf16 for the streamed operands.
    n_pad, tile = _choose_tiles(n)
    f_pad = _round_up(f_in, 128)
    h_pad = _round_up(gcn_dim, 128)
    c_pad = _round_up(num_class, 128)

    a_pad = _pad2d(a_col, n_pad, n_pad).astype(jnp.bfloat16)
    scale = _pad2d(d_inv_sqrt.reshape(-1, 1), n_pad, 1).astype(jnp.float32)
    x_pad = _pad2d(x, n_pad, f_pad).astype(jnp.bfloat16)
    w1 = _pad2d(params["w1"], f_pad, h_pad).astype(jnp.bfloat16)
    b1 = _pad2d(params["b1"].reshape(1, -1), 1, h_pad).astype(jnp.float32)
    w2 = _pad2d(params["w2"], h_pad, c_pad).astype(jnp.bfloat16)
    b2 = _pad2d(params["b2"].reshape(1, -1), 1, c_pad).astype(jnp.float32)

    # Keep XW resident in VMEM (single DMA) when it fits the budget;
    # otherwise stream (tk, h) panels per k-step.
    xw_resident = n_pad * max(h_pad, c_pad) * 2 <= _XW_RESIDENT_MAX

    # ----- Layer 1 feature transform: XW1 = X @ W1 -----
    xw1 = feature_transform(x_pad, w1, tm=tile)

    # ----- Layer 1 aggregate + bias + ReLU, fused with layer-2 X @ W2 -----
    # (dropout is identity at inference)
    xw2 = gcn_layer1_fused(a_pad, xw1, scale, b1, w2,
                           tm=tile, tk=tile, xw_resident=xw_resident)

    # ----- Layer 2 aggregate + bias + log_softmax(dim=1) -----
    z = gcn_layer2_logsoftmax(a_pad, xw2, scale, b2, tm=tile, tk=tile,
                              xw_resident=xw_resident,
                              num_valid_cols=num_class)

    return z[:n, :num_class]


def kipf_gcn_reference(x, edge_index, params):
    """Pure-JAX f32 reference for correctness checking."""
    n = x.shape[0]
    a_col, d_inv_sqrt = build_normalized_adjacency_colscaled(edge_index, n)
    a_hat = d_inv_sqrt[:, None] * a_col
    h = jnp.maximum(a_hat @ (x @ params["w1"]) + params["b1"], 0.0)
    z = a_hat @ (h @ params["w2"]) + params["b2"]
    return jax.nn.log_softmax(z, axis=1)


# ----------------------------------- main ----------------------------------


if __name__ == "__main__":
    # Small, module-consistent shapes:
    #   N nodes = 32, num_features = 16, gcn_dim = 32, num_class = 8
    N, F_IN, GCN_DIM, NUM_CLASS, NUM_EDGES = 32, 16, 32, 8, 64

    key = jax.random.PRNGKey(0)
    k_x, k_e, k_w1, k_w2 = jax.random.split(key, 4)

    x = jax.random.normal(k_x, (N, F_IN), dtype=jnp.float32)
    edge_index = jax.random.randint(k_e, (2, NUM_EDGES), 0, N, dtype=jnp.int32)

    params = {
        "w1": jax.random.normal(k_w1, (F_IN, GCN_DIM), dtype=jnp.float32)
        * (1.0 / jnp.sqrt(F_IN)),
        "b1": jnp.zeros((1, GCN_DIM), dtype=jnp.float32),
        "w2": jax.random.normal(k_w2, (GCN_DIM, NUM_CLASS), dtype=jnp.float32)
        * (1.0 / jnp.sqrt(GCN_DIM)),
        "b2": jnp.zeros((1, NUM_CLASS), dtype=jnp.float32),
    }

    out = kipf_gcn_forward(x, edge_index, params)
    jax.block_until_ready(out)

    assert out.shape == (N, NUM_CLASS)
    # log_softmax rows sum (in prob space) to ~1
    assert bool(jnp.allclose(jnp.sum(jnp.exp(out), axis=1), 1.0, atol=1e-4))
    # matches f32 reference up to bf16 streaming precision
    ref = kipf_gcn_reference(x, edge_index, params)
    assert bool(jnp.allclose(out, ref, atol=2.5e-1))

    print("KERNEL_OK")
</pallas_src>

<mosaic_0001>
module attributes {stable_mosaic.version = 11 : i64} {
  func.func @_feature_transform_kernel(%arg0: i32, %arg1: memref<128x128xbf16, #tpu.memory_space<vmem>>, %arg2: memref<128x128xbf16, #tpu.memory_space<vmem>>, %arg3: memref<128x128xbf16, #tpu.memory_space<vmem>>) attributes {dimension_semantics = [#tpu.dimension_semantics<parallel>], iteration_bounds = array<i64: 1>, scalar_prefetch = 0 : i64, scratch_operands = 0 : i64, tpu.core_type = #tpu.core_type<tc>, window_params = [{transform_indices = @transform_0, window_bounds = array<i64: 128, 128>}, {pipeline_mode = #tpu.pipeline_mode<synchronous>, transform_indices = @transform_1, window_bounds = array<i64: 128, 128>}, {transform_indices = @transform_2, window_bounds = array<i64: 128, 128>}]} {
    %c0 = arith.constant 0 : index
    %c0_0 = arith.constant 0 : index
    %0 = vector.load %arg1[%c0, %c0_0] : memref<128x128xbf16, #tpu.memory_space<vmem>>, vector<128x128xbf16>
    %c0_1 = arith.constant 0 : index
    %c0_2 = arith.constant 0 : index
    %1 = vector.load %arg2[%c0_1, %c0_2] : memref<128x128xbf16, #tpu.memory_space<vmem>>, vector<128x128xbf16>
    %cst = arith.constant dense<0.000000e+00> : vector<128x128xf32>
    %2 = tpu.matmul %0, %1, %cst {dimension_numbers = #tpu.dot_dimension_numbers<[1], [0], [0], [1], [0, 0, 1, 1], [], []>} : vector<128x128xbf16>, vector<128x128xbf16>, vector<128x128xf32> -> vector<128x128xf32>
    %3 = arith.truncf %2 : vector<128x128xf32> to vector<128x128xbf16>
    %c0_3 = arith.constant 0 : index
    %c0_4 = arith.constant 0 : index
    %4 = vector.load %arg3[%c0_3, %c0_4] : memref<128x128xbf16, #tpu.memory_space<vmem>>, vector<128x128xbf16>
    tpu.vector_store %arg3[%c0_3, %c0_4], %3 {strides = array<i32>} : memref<128x128xbf16, #tpu.memory_space<vmem>>, vector<128x128xbf16>,
    return
  }
  func.func @transform_0(%arg0: i32) -> (i32, i32) {
    %c0_i32 = arith.constant 0 : i32
    %c0_i32_0 = arith.constant 0 : i32
    return %arg0, %c0_i32 : i32, i32
  }
  func.func @transform_1(%arg0: i32) -> (i32, i32) {
    %c0_i32 = arith.constant 0 : i32
    %c0_i32_0 = arith.constant 0 : i32
    %c0_i32_1 = arith.constant 0 : i32
    return %c0_i32, %c0_i32_0 : i32, i32
  }
  func.func @transform_2(%arg0: i32) -> (i32, i32) {
    %c0_i32 = arith.constant 0 : i32
    %c0_i32_0 = arith.constant 0 : i32
    return %arg0, %c0_i32 : i32, i32
  }
}

</mosaic_0001>

<bundles_post_ra>
// kernel: tpu_custom_call.1
= control target key start
LH: loop header
LB: loop body
LE: loop exit
PB: predicated region body
PF: predicated region fallthrough
CT: control target
= control target key end

     0   :  { %7 = vsyncpa [#allocation3], 0  ;;  %s545_s0 = inlined_call_operand.hbm [shape: bf16[128,128], index: 0, kind: input, shape index: {}]   ;;  %s546_s1 = inlined_call_operand.hbm [shape: bf16[128,128], index: 1, kind: input, shape index: {}]   ;;  %s547_s2 = inlined_call_operand.hbm [shape: bf16[128,128], index: 2, kind: output, shape index: {}]  }
   0x1   :  { %8 = vsyncpa [#allocation6], 0 }
   0x2   :  { %9 = vsyncpa [#allocation4], 0  ;;  %s14_s11 = sshll.u32 %s545_s0, 4  ;;  %s507_s12 = smov [#allocation2]   ;;  %s15_s11 = int_to_ptr.hbm [resolvable:$true] %s14_s11 }
   0x3   :  { %s16_s13 = sshll.u32 %s507_s12, 4  ;;  %s27_s16 = sshll.u32 %s546_s1, 4  ;;  %s17_s13 = int_to_ptr.vmem [resolvable:$true] %s16_s13  ;;  %s28_s16 = int_to_ptr.hbm [resolvable:$true] %s27_s16 }
   0x4   :  { %s508_s17 = smov 64   ;;  %s509_s18 = smov 4  }
   0x5   :  { %22 = dma.hbm_to_vmem [thread:$0]  %s15_s11, 1024, %s17_s13, [#allocation3], %s508_s17, %s508_s17, %s509_s18  }
   0x6   :  { %s510_s19 = smov [#allocation5]  }
   0x7   :  { %s29_s20 = sshll.u32 %s510_s19, 4  ;;  %s30_s20 = int_to_ptr.vmem [resolvable:$true] %s29_s20 }
   0x8   :  { %35 = dma.hbm_to_vmem [thread:$0]  %s28_s16, 1024, %s30_s20, [#allocation6], %s508_s17, %s508_s17, %s509_s18  }
   0x9   :  { %501 = dma.done.wait [#allocation3], 1024  }
   0xa   :  { %502 = vsyncadd [#allocation3], 4294966272 }
   0xb   :  { %503 = dma.done.wait [#allocation6], 1024  }
   0xc   :  { %504 = vsyncadd [#allocation6], 4294966272  ;;  %v352_v0 = vld [vmem:[#allocation5 + $0x38] sm:$0xff]  ;;  %v351_v1 = vld [vmem:[#allocation5 + $0x30] sm:$0xff]  ;;  %s511_s0 = smov [#allocation7]   ;;  %s259_s23 = sshll.u32 %s547_s2, 4  ;;  %s260_s23 = int_to_ptr.hbm [resolvable:$true] %s259_s23 }
   0xd   :  { %172 = vmatpush.bf16.msra.mxu0 %v352_v0  ;;  %400 = vmatpush.bf16.msra.mxu1 %v352_v0  ;;  %v350_v2 = vld [vmem:[#allocation5 + $0x28] sm:$0xff]  ;;  %v349_v3 = vld [vmem:[#allocation5 + $0x20] sm:$0xff]  ;;  %v348_v4 = vld [vmem:[#allocation5 + $0x18] sm:$0xff]  ;;  %s257_s1 = sshll.u32 %s511_s0, 4  ;;  %s258_s1 = int_to_ptr.vmem [resolvable:$true] %s257_s1 }
   0xe   :  { %401 = vmatpush.bf16.msra.mxu2 %v352_v0  ;;  %402 = vmatpush.bf16.msra.mxu3 %v352_v0  ;;  %v347_v5 = vld [vmem:[#allocation5 + $0x10] sm:$0xff]  ;;  %v346_v6 = vld [vmem:[#allocation5 + $0x8] sm:$0xff]  ;;  %v345_v7 = vld [vmem:[#allocation5] sm:$0xff] }
   0xf   :  { %v337_v8 = vld [vmem:[#allocation2] sm:$0xff]  ;;  %v339_v9 = vld [vmem:[#allocation2 + $0x10] sm:$0xff]  ;;  %v338_v12 = vld [vmem:[#allocation2 + $0x8] sm:$0xff] }
  0x10   :  { %v341_v10 = vld [vmem:[#allocation2 + $0x20] sm:$0xff]  ;;  %v343_v11 = vld [vmem:[#allocation2 + $0x30] sm:$0xff]  ;;  %v340_v13 = vld [vmem:[#allocation2 + $0x18] sm:$0xff] }
  0x11   :  { %173 = vmatpush.bf16.msra.mxu0 %v351_v1  ;;  %403 = vmatpush.bf16.msra.mxu1 %v351_v1  ;;  %v342_v14 = vld [vmem:[#allocation2 + $0x28] sm:$0xff]  ;;  %v344_v15 = vld [vmem:[#allocation2 + $0x38] sm:$0xff] }
  0x12   :  { %404 = vmatpush.bf16.msra.mxu2 %v351_v1  ;;  %405 = vmatpush.bf16.msra.mxu3 %v351_v1 }
  0x15   :  { %174 = vmatpush.bf16.msra.mxu0 %v350_v2  ;;  %406 = vmatpush.bf16.msra.mxu1 %v350_v2 }
  0x16   :  { %407 = vmatpush.bf16.msra.mxu2 %v350_v2  ;;  %408 = vmatpush.bf16.msra.mxu3 %v350_v2 }
  0x19   :  { %175 = vmatpush.bf16.msra.mxu0 %v349_v3  ;;  %409 = vmatpush.bf16.msra.mxu1 %v349_v3 }
  0x1a   :  { %410 = vmatpush.bf16.msra.mxu2 %v349_v3  ;;  %411 = vmatpush.bf16.msra.mxu3 %v349_v3 }
  0x1d   :  { %176 = vmatpush.bf16.msra.mxu0 %v348_v4  ;;  %412 = vmatpush.bf16.msra.mxu1 %v348_v4 }
  0x1e   :  { %413 = vmatpush.bf16.msra.mxu2 %v348_v4  ;;  %414 = vmatpush.bf16.msra.mxu3 %v348_v4 }
  0x21   :  { %177 = vmatpush.bf16.msra.mxu0 %v347_v5  ;;  %415 = vmatpush.bf16.msra.mxu1 %v347_v5 }
  0x22   :  { %416 = vmatpush.bf16.msra.mxu2 %v347_v5  ;;  %417 = vmatpush.bf16.msra.mxu3 %v347_v5 }
  0x25   :  { %178 = vmatpush.bf16.msra.mxu0 %v346_v6  ;;  %418 = vmatpush.bf16.msra.mxu1 %v346_v6 }
  0x26   :  { %419 = vmatpush.bf16.msra.mxu2 %v346_v6  ;;  %420 = vmatpush.bf16.msra.mxu3 %v346_v6 }
  0x29   :  { %179 = vmatpush.bf16.msra.mxu0 %v345_v7  ;;  %421 = vmatpush.bf16.msra.mxu1 %v345_v7 }
  0x2a   :  { %422 = vmatpush.bf16.msra.mxu2 %v345_v7  ;;  %423 = vmatpush.bf16.msra.mxu3 %v345_v7 }
  0x2c   :  { %180 = vmatmul.bf16.vlgmr.msra.gmra.mxu0 %v337_v8  ;;  %190 = vmatmul.bf16.vlgmr.msra.gmra.mxu1 %v339_v9 }
  0x2d   :  { %200 = vmatmul.bf16.vlgmr.msra.gmra.mxu2 %v341_v10  ;;  %210 = vmatmul.bf16.vlgmr.msra.gmra.mxu3 %v343_v11 }
  0x3c   :  { %185 = vmatmul.bf16.gmra.mxu0 %v338_v12  ;;  %195 = vmatmul.bf16.gmra.mxu1 %v340_v13 }
  0x3d   :  { %205 = vmatmul.bf16.gmra.mxu2 %v342_v14  ;;  %215 = vmatmul.bf16.gmra.mxu3 %v344_v15 }
  0xa9   :  { %v181_v16 = vpop.f32.mrf.mxu0  ;;  %v191_v17 = vpop.f32.mrf.mxu1 }
  0xb0   :  { %v201_v18 = vpop.f32.mrf.mxu2  ;;  %v211_v19 = vpop.f32.mrf.mxu3 }
  0xb1   :  { %v183_v20 = vpop.f32.mrf.mxu0  ;;  %v193_v21 = vpop.f32.mrf.mxu1 }
  0xb2   :  { %v356_v22 = vpack.c.bf16 %v183_v20, %v181_v16  ;;  %v366_v23 = vpack.c.bf16 %v193_v21, %v191_v17 }
  0xb4   :  { %357 = vst [vmem:[#allocation7] sm:$0xff] %v356_v22  }
  0xb5   :  { %394 = vst [vmem:[#allocation7 + $0x10] sm:$0xff] %v366_v23  }
  0xb8   :  { %v203_v24 = vpop.f32.mrf.mxu2  ;;  %v213_v25 = vpop.f32.mrf.mxu3 }
  0xb9   :  { %v376_v26 = vpack.c.bf16 %v203_v24, %v201_v18  ;;  %v386_v27 = vpack.c.bf16 %v213_v25, %v211_v19  ;;  %v186_v28 = vpop.f32.mrf.mxu0  ;;  %v196_v29 = vpop.f32.mrf.mxu1 }
  0xbb   :  { %396 = vst [vmem:[#allocation7 + $0x20] sm:$0xff] %v376_v26  }
  0xbc   :  { %398 = vst [vmem:[#allocation7 + $0x30] sm:$0xff] %v386_v27  }
  0xc0   :  { %v206_v30 = vpop.f32.mrf.mxu2  ;;  %v216_v31 = vpop.f32.mrf.mxu3 }
  0xc1   :  { %v188_v32 = vpop.f32.mrf.mxu0  ;;  %v198_v33 = vpop.f32.mrf.mxu1 }
  0xc2   :  { %v361_v34 = vpack.c.bf16 %v188_v32, %v186_v28  ;;  %v371_v35 = vpack.c.bf16 %v198_v33, %v196_v29 }
  0xc4   :  { %393 = vst [vmem:[#allocation7 + $0x8] sm:$0xff] %v361_v34  }
  0xc5   :  { %395 = vst [vmem:[#allocation7 + $0x18] sm:$0xff] %v371_v35  }
  0xc8   :  { %v208_v36 = vpop.f32.mrf.mxu2  ;;  %v218_v37 = vpop.f32.mrf.mxu3 }
  0xc9   :  { %v381_v38 = vpack.c.bf16 %v208_v36, %v206_v30  ;;  %v391_v39 = vpack.c.bf16 %v218_v37, %v216_v31 }
  0xcb   :  { %397 = vst [vmem:[#allocation7 + $0x28] sm:$0xff] %v381_v38  }
  0xcc   :  { %399 = vst [vmem:[#allocation7 + $0x38] sm:$0xff] %v391_v39  }
  0xcd   :  { %265 = dma.vmem_to_hbm [thread:$0]  %s258_s1, 1024, %s260_s23, [#allocation4], %s508_s17, %s508_s17, %s509_s18  }
  0xce   :  { %505 = dma.done.wait [#allocation4], 1024  }
  0xcf   :  { %506 = vsyncadd [#allocation4], 4294966272 }
  0xd0   :  { %270 = vsyncpa [#allocation3], 1 }
  0xd1   :  { %271 = vsyncpa [#allocation6], 1 }
  0xd2   :  { %272 = vsyncpa [#allocation4], 1 }

</bundles_post_ra>
